<compile_context>
chip_gen: v7x
topology: tpu7x:2x2x1
jax: 0.10.0
libtpu: 0.0.40
codegen_flags: <defaults>
</compile_context>

<pallas_src>
import functools

import jax
import jax.numpy as jnp
from jax.experimental import pallas as pl
from jax.experimental.pallas import tpu as pltpu

HIDDEN = 128   # hidden1..hidden4 sizes from the PyTorch module
LANE = 128     # lane width used for the padded final weight / bias pack


def _round_up(n, m):
    return (n + m - 1) // m * m


def _mlp_kernel(out_size, x_ref, w1_ref, wh_ref, w5_ref, b_ref, o_ref):
    """Whole 5-layer MLP on one batch tile. bf16 matmuls on MXU, f32 epilogue."""
    x = x_ref[...].astype(jnp.bfloat16)

    # layer 1
    h = jnp.dot(x, w1_ref[...], preferred_element_type=jnp.float32) + b_ref[0:1, :]
    h = jnp.maximum(h, 0.0)

    # layers 2..4 (stacked hidden weights)
    for layer in range(3):
        h = jnp.dot(h.astype(jnp.bfloat16), wh_ref[layer],
                    preferred_element_type=jnp.float32) + b_ref[layer + 1:layer + 2, :]
        h = jnp.maximum(h, 0.0)

    # layer 5: MXU matmul at a lane-friendly (128, 128) shape, then store only
    # the out_size useful lanes (padded w5 columns / b5 lanes are exact zeros).
    out = jnp.dot(h.astype(jnp.bfloat16), w5_ref[...],
                  preferred_element_type=jnp.float32) + b_ref[4:5, :]
    o_ref[...] = out[:, :out_size].astype(o_ref.dtype)


def init_params(key, input_size, output_size):
    """nn.Linear-style init: U(-1/sqrt(fan_in), 1/sqrt(fan_in)). Weights stored (in, out)."""
    dims = [(input_size, HIDDEN), (HIDDEN, HIDDEN), (HIDDEN, HIDDEN),
            (HIDDEN, HIDDEN), (HIDDEN, output_size)]
    params = {}
    for idx, (fan_in, fan_out) in enumerate(dims, start=1):
        key, kw, kb = jax.random.split(key, 3)
        bound = 1.0 / jnp.sqrt(jnp.float32(fan_in))
        params[f"w{idx}"] = jax.random.uniform(
            kw, (fan_in, fan_out), jnp.float32, minval=-bound, maxval=bound)
        params[f"b{idx}"] = jax.random.uniform(
            kb, (1, fan_out), jnp.float32, minval=-bound, maxval=bound)
    return params


def pack_params(params, out_size):
    """Cast weights to bf16, stack hidden weights, zero-pad w5 to 128 lanes,
    and pack all five biases into one (8, 128) f32 array (rows 0..4 = b1..b5)."""
    assert out_size <= LANE, "packing scheme assumes out_size <= 128"
    w1 = params["w1"].astype(jnp.bfloat16)
    wh = jnp.stack([params["w2"], params["w3"], params["w4"]]).astype(jnp.bfloat16)

    w5 = jnp.zeros((HIDDEN, LANE), jnp.float32)
    w5 = w5.at[:, :out_size].set(params["w5"]).astype(jnp.bfloat16)

    b = jnp.zeros((8, LANE), jnp.float32)
    for i in range(1, 5):
        b = b.at[i - 1, :HIDDEN].set(params[f"b{i}"][0])
    b = b.at[4, :out_size].set(params["b5"][0])

    return {"w1": w1, "wh": wh, "w5": w5, "b": b}


def mlp_forward(x, packed, out_size, *, block_batch=2048):
    """x: (B, input_size) f32. Returns (B, out_size) f32. No wrapper pad/slice."""
    B, in_size = x.shape
    assert out_size <= LANE

    # Batch tile: multiple of 8 (f32 sublane), capped so tiny batches don't
    # over-allocate.  Ragged last block is masked by Pallas (no jnp.pad).
    block_batch = max(8, (block_batch // 8) * 8)
    block_batch = min(block_batch, _round_up(B, 8))
    grid = (pl.cdiv(B, block_batch),)

    # Advisory cost estimate (mem-bound call; helps XLA overlap neighbors).
    flops = 2 * B * (in_size * HIDDEN + 3 * HIDDEN * HIDDEN + HIDDEN * LANE)
    bytes_accessed = (B * in_size * 4 + B * out_size * 4
                      + packed["w1"].size * 2 + packed["wh"].size * 2
                      + packed["w5"].size * 2 + packed["b"].size * 4)

    kernel = functools.partial(_mlp_kernel, out_size)

    return pl.pallas_call(
        kernel,
        out_shape=jax.ShapeDtypeStruct((B, out_size), jnp.float32),
        grid_spec=pltpu.PrefetchScalarGridSpec(
            num_scalar_prefetch=0,
            grid=grid,
            in_specs=[
                pl.BlockSpec((block_batch, in_size), lambda i: (i, 0)),
                pl.BlockSpec(packed["w1"].shape, lambda i: (0, 0)),
                pl.BlockSpec(packed["wh"].shape, lambda i: (0, 0, 0)),
                pl.BlockSpec(packed["w5"].shape, lambda i: (0, 0)),
                pl.BlockSpec(packed["b"].shape, lambda i: (0, 0)),
            ],
            out_specs=pl.BlockSpec((block_batch, out_size), lambda i: (i, 0)),
        ),
        compiler_params=pltpu.CompilerParams(
            dimension_semantics=("parallel",)),
        cost_estimate=pl.CostEstimate(
            flops=flops, transcendentals=0, bytes_accessed=bytes_accessed),
    )(x, packed["w1"], packed["wh"], packed["w5"], packed["b"])


def mlp_reference(x, params):
    """Pure-JAX reference emulating the kernel's bf16-operand / f32-accumulate dots."""
    def bdot(a, w):
        return jnp.dot(a.astype(jnp.bfloat16), w.astype(jnp.bfloat16),
                       preferred_element_type=jnp.float32)
    h = x
    for i in range(1, 5):
        h = jnp.maximum(bdot(h, params[f"w{i}"]) + params[f"b{i}"], 0.0)
    return bdot(h, params["w5"]) + params["b5"]


if __name__ == "__main__":
    key = jax.random.PRNGKey(0)
    k_params, k_x1, k_x2 = jax.random.split(key, 3)

    input_size = 32
    output_size = 8

    params = init_params(k_params, input_size, output_size)
    packed = pack_params(params, output_size)

    # Small-shape check (single tile, exact multiple of 8).
    x_small = jax.random.normal(k_x1, (8, input_size), jnp.float32)
    out_small = jax.block_until_ready(mlp_forward(x_small, packed, output_size))
    ref_small = mlp_reference(x_small, params)
    assert out_small.shape == (8, output_size)
    assert jnp.allclose(out_small, ref_small, atol=1e-2, rtol=1e-2), "small-batch mismatch"

    # Multi-tile check: grid > 1 with a ragged last block (no wrapper pad/slice).
    x_big = jax.random.normal(k_x2, (300, input_size), jnp.float32)
    out_big = jax.block_until_ready(
        mlp_forward(x_big, packed, output_size, block_batch=128))
    ref_big = mlp_reference(x_big, params)
    assert out_big.shape == (300, output_size)
    assert jnp.allclose(out_big, ref_big, atol=1e-2, rtol=1e-2), "multi-tile mismatch"

    print("KERNEL_OK")
</pallas_src>

<mosaic_0001>
module attributes {stable_mosaic.version = 11 : i64} {
  func.func @_mlp_kernel(%arg0: i32, %arg1: memref<8x32xf32, #tpu.memory_space<vmem>>, %arg2: memref<32x128xbf16, #tpu.memory_space<vmem>>, %arg3: memref<3x128x128xbf16, #tpu.memory_space<vmem>>, %arg4: memref<128x128xbf16, #tpu.memory_space<vmem>>, %arg5: memref<8x128xf32, #tpu.memory_space<vmem>>, %arg6: memref<8x8xf32, #tpu.memory_space<vmem>>) attributes {dimension_semantics = [#tpu.dimension_semantics<parallel>], iteration_bounds = array<i64: 1>, scalar_prefetch = 0 : i64, scratch_operands = 0 : i64, tpu.core_type = #tpu.core_type<tc>, window_params = [{transform_indices = @transform_0, window_bounds = array<i64: 8, 32>}, {pipeline_mode = #tpu.pipeline_mode<synchronous>, transform_indices = @transform_1, window_bounds = array<i64: 32, 128>}, {pipeline_mode = #tpu.pipeline_mode<synchronous>, transform_indices = @transform_2, window_bounds = array<i64: 3, 128, 128>}, {pipeline_mode = #tpu.pipeline_mode<synchronous>, transform_indices = @transform_3, window_bounds = array<i64: 128, 128>}, {pipeline_mode = #tpu.pipeline_mode<synchronous>, transform_indices = @transform_4, window_bounds = array<i64: 8, 128>}, {transform_indices = @transform_5, window_bounds = array<i64: 8, 8>}]} {
    %c0 = arith.constant 0 : index
    %c0_0 = arith.constant 0 : index
    %0 = vector.load %arg1[%c0, %c0_0] : memref<8x32xf32, #tpu.memory_space<vmem>>, vector<8x32xf32>
    %1 = arith.truncf %0 : vector<8x32xf32> to vector<8x32xbf16>
    %c0_1 = arith.constant 0 : index
    %c0_2 = arith.constant 0 : index
    %2 = vector.load %arg2[%c0_1, %c0_2] : memref<32x128xbf16, #tpu.memory_space<vmem>>, vector<32x128xbf16>
    %cst = arith.constant dense<0.000000e+00> : vector<8x128xf32>
    %3 = tpu.matmul %1, %2, %cst {dimension_numbers = #tpu.dot_dimension_numbers<[1], [0], [0], [1], [0, 0, 1, 1], [], []>} : vector<8x32xbf16>, vector<32x128xbf16>, vector<8x128xf32> -> vector<8x128xf32>
    %c0_3 = arith.constant 0 : index
    %c0_4 = arith.constant 0 : index
    %4 = vector.load %arg5[%c0_3, %c0_4] : memref<8x128xf32, #tpu.memory_space<vmem>>, vector<1x128xf32>
    %5 = vector.broadcast %4 : vector<1x128xf32> to vector<8x128xf32>
    %6 = arith.addf %3, %5 : vector<8x128xf32>
    %cst_5 = arith.constant 0.000000e+00 : f32
    %7 = vector.broadcast %cst_5 : f32 to vector<8x128xf32>
    %8 = arith.maximumf %6, %7 : vector<8x128xf32>
    %9 = arith.truncf %8 : vector<8x128xf32> to vector<8x128xbf16>
    %c0_6 = arith.constant 0 : index
    %c0_7 = arith.constant 0 : index
    %c0_8 = arith.constant 0 : index
    %10 = vector.load %arg3[%c0_6, %c0_7, %c0_8] : memref<3x128x128xbf16, #tpu.memory_space<vmem>>, vector<1x128x128xbf16>
    %11 = vector.shape_cast %10 : vector<1x128x128xbf16> to vector<128x128xbf16>
    %cst_9 = arith.constant dense<0.000000e+00> : vector<8x128xf32>
    %12 = tpu.matmul %9, %11, %cst_9 {dimension_numbers = #tpu.dot_dimension_numbers<[1], [0], [0], [1], [0, 0, 1, 1], [], []>} : vector<8x128xbf16>, vector<128x128xbf16>, vector<8x128xf32> -> vector<8x128xf32>
    %c1 = arith.constant 1 : index
    %c0_10 = arith.constant 0 : index
    %13 = vector.load %arg5[%c1, %c0_10] : memref<8x128xf32, #tpu.memory_space<vmem>>, vector<1x128xf32>
    %14 = vector.broadcast %13 : vector<1x128xf32> to vector<8x128xf32>
    %15 = arith.addf %12, %14 : vector<8x128xf32>
    %cst_11 = arith.constant 0.000000e+00 : f32
    %16 = vector.broadcast %cst_11 : f32 to vector<8x128xf32>
    %17 = arith.maximumf %15, %16 : vector<8x128xf32>
    %18 = arith.truncf %17 : vector<8x128xf32> to vector<8x128xbf16>
    %c1_12 = arith.constant 1 : index
    %c0_13 = arith.constant 0 : index
    %c0_14 = arith.constant 0 : index
    %19 = vector.load %arg3[%c1_12, %c0_13, %c0_14] : memref<3x128x128xbf16, #tpu.memory_space<vmem>>, vector<1x128x128xbf16>
    %20 = vector.shape_cast %19 : vector<1x128x128xbf16> to vector<128x128xbf16>
    %cst_15 = arith.constant dense<0.000000e+00> : vector<8x128xf32>
    %21 = tpu.matmul %18, %20, %cst_15 {dimension_numbers = #tpu.dot_dimension_numbers<[1], [0], [0], [1], [0, 0, 1, 1], [], []>} : vector<8x128xbf16>, vector<128x128xbf16>, vector<8x128xf32> -> vector<8x128xf32>
    %c2 = arith.constant 2 : index
    %c0_16 = arith.constant 0 : index
    %22 = vector.load %arg5[%c2, %c0_16] : memref<8x128xf32, #tpu.memory_space<vmem>>, vector<1x128xf32>
    %23 = vector.broadcast %22 : vector<1x128xf32> to vector<8x128xf32>
    %24 = arith.addf %21, %23 : vector<8x128xf32>
    %cst_17 = arith.constant 0.000000e+00 : f32
    %25 = vector.broadcast %cst_17 : f32 to vector<8x128xf32>
    %26 = arith.maximumf %24, %25 : vector<8x128xf32>
    %27 = arith.truncf %26 : vector<8x128xf32> to vector<8x128xbf16>
    %c2_18 = arith.constant 2 : index
    %c0_19 = arith.constant 0 : index
    %c0_20 = arith.constant 0 : index
    %28 = vector.load %arg3[%c2_18, %c0_19, %c0_20] : memref<3x128x128xbf16, #tpu.memory_space<vmem>>, vector<1x128x128xbf16>
    %29 = vector.shape_cast %28 : vector<1x128x128xbf16> to vector<128x128xbf16>
    %cst_21 = arith.constant dense<0.000000e+00> : vector<8x128xf32>
    %30 = tpu.matmul %27, %29, %cst_21 {dimension_numbers = #tpu.dot_dimension_numbers<[1], [0], [0], [1], [0, 0, 1, 1], [], []>} : vector<8x128xbf16>, vector<128x128xbf16>, vector<8x128xf32> -> vector<8x128xf32>
    %c3 = arith.constant 3 : index
    %c0_22 = arith.constant 0 : index
    %31 = vector.load %arg5[%c3, %c0_22] : memref<8x128xf32, #tpu.memory_space<vmem>>, vector<1x128xf32>
    %32 = vector.broadcast %31 : vector<1x128xf32> to vector<8x128xf32>
    %33 = arith.addf %30, %32 : vector<8x128xf32>
    %cst_23 = arith.constant 0.000000e+00 : f32
    %34 = vector.broadcast %cst_23 : f32 to vector<8x128xf32>
    %35 = arith.maximumf %33, %34 : vector<8x128xf32>
    %36 = arith.truncf %35 : vector<8x128xf32> to vector<8x128xbf16>
    %c0_24 = arith.constant 0 : index
    %c0_25 = arith.constant 0 : index
    %37 = vector.load %arg4[%c0_24, %c0_25] : memref<128x128xbf16, #tpu.memory_space<vmem>>, vector<128x128xbf16>
    %cst_26 = arith.constant dense<0.000000e+00> : vector<8x128xf32>
    %38 = tpu.matmul %36, %37, %cst_26 {dimension_numbers = #tpu.dot_dimension_numbers<[1], [0], [0], [1], [0, 0, 1, 1], [], []>} : vector<8x128xbf16>, vector<128x128xbf16>, vector<8x128xf32> -> vector<8x128xf32>
    %c4 = arith.constant 4 : index
    %c0_27 = arith.constant 0 : index
    %39 = vector.load %arg5[%c4, %c0_27] : memref<8x128xf32, #tpu.memory_space<vmem>>, vector<1x128xf32>
    %40 = vector.broadcast %39 : vector<1x128xf32> to vector<8x128xf32>
    %41 = arith.addf %38, %40 : vector<8x128xf32>
    %42 = vector.extract_strided_slice %41 {offsets = [0, 0], sizes = [8, 8], strides = [1, 1]} : vector<8x128xf32> to vector<8x8xf32>
    %c0_28 = arith.constant 0 : index
    %c0_29 = arith.constant 0 : index
    %43 = vector.load %arg6[%c0_28, %c0_29] : memref<8x8xf32, #tpu.memory_space<vmem>>, vector<8x8xf32>
    tpu.vector_store %arg6[%c0_28, %c0_29], %42 {strides = array<i32>} : memref<8x8xf32, #tpu.memory_space<vmem>>, vector<8x8xf32>,
    return
  }
  func.func @transform_0(%arg0: i32) -> (i32, i32) {
    %c0_i32 = arith.constant 0 : i32
    %c0_i32_0 = arith.constant 0 : i32
    return %arg0, %c0_i32 : i32, i32
  }
  func.func @transform_1(%arg0: i32) -> (i32, i32) {
    %c0_i32 = arith.constant 0 : i32
    %c0_i32_0 = arith.constant 0 : i32
    %c0_i32_1 = arith.constant 0 : i32
    return %c0_i32, %c0_i32_0 : i32, i32
  }
  func.func @transform_2(%arg0: i32) -> (i32, i32, i32) {
    %c0_i32 = arith.constant 0 : i32
    %c0_i32_0 = arith.constant 0 : i32
    %c0_i32_1 = arith.constant 0 : i32
    %c0_i32_2 = arith.constant 0 : i32
    return %c0_i32, %c0_i32_0, %c0_i32_1 : i32, i32, i32
  }
  func.func @transform_3(%arg0: i32) -> (i32, i32) {
    %c0_i32 = arith.constant 0 : i32
    %c0_i32_0 = arith.constant 0 : i32
    %c0_i32_1 = arith.constant 0 : i32
    return %c0_i32, %c0_i32_0 : i32, i32
  }
  func.func @transform_4(%arg0: i32) -> (i32, i32) {
    %c0_i32 = arith.constant 0 : i32
    %c0_i32_0 = arith.constant 0 : i32
    %c0_i32_1 = arith.constant 0 : i32
    return %c0_i32, %c0_i32_0 : i32, i32
  }
  func.func @transform_5(%arg0: i32) -> (i32, i32) {
    %c0_i32 = arith.constant 0 : i32
    %c0_i32_0 = arith.constant 0 : i32
    return %arg0, %c0_i32 : i32, i32
  }
}

</mosaic_0001>

<bundles_post_ra>
// kernel: tpu_custom_call.1
= control target key start
LH: loop header
LB: loop body
LE: loop exit
PB: predicated region body
PF: predicated region fallthrough
CT: control target
= control target key end

     0   :  { %10 = vsyncpa [#allocation3], 0  ;;  %s1102_s0 = inlined_call_operand.hbm [shape: f32[8,32], index: 0, kind: input, shape index: {}]   ;;  %s1103_s1 = inlined_call_operand.hbm [shape: bf16[32,128], index: 1, kind: input, shape index: {}]   ;;  %s1104_s2 = inlined_call_operand.hbm [shape: bf16[3,128,128], index: 2, kind: input, shape index: {}]   ;;  %s1105_s3 = inlined_call_operand.hbm [shape: bf16[128,128], index: 3, kind: input, shape index: {}]   ;;  %s1106_s4 = inlined_call_operand.vmem [shape: f32[8,128], index: 4, kind: input, shape index: {}]   ;;  %s1107_s5 = inlined_call_operand.hbm [shape: f32[8,8], index: 5, kind: output, shape index: {}]  }
   0x1   :  { %11 = vsyncpa [#allocation6], 0 }
   0x2   :  { %12 = vsyncpa [#allocation9], 0 }
   0x3   :  { %13 = vsyncpa [#allocation4], 0  ;;  %s935_s18 = smov [#allocation5]   ;;  %s817_s22 = scalar_lea.hbm %s1103_s1, 256 }
   0x4   :  { %s29_s19 = sshll.u32 %s935_s18, 4  ;;  %p818_p0 = scmp.ne.s32.totalorder %s1103_s1, %s817_s22  ;;  %s30_s19 = int_to_ptr.vmem [resolvable:$true] %s29_s19 }
   0x5   :  { %p821_p1 = scmp.lt.u32.totalorder %s817_s22, %s1103_s1 }
   0x7   :  { %p823_p2 = pnand %p821_p1, %p818_p0 }
   0x9   :  { %826 = shalt.err (!%p823_p2)
}
   0xa   :  { %s827_s27 = scalar_lea.vmem %s30_s19, 256  ;;  %p832_p4 = scmp.lt.s32.totalorder %s30_s19, %s30_s19 }
   0xb   :  { %p828_p3 = scmp.ne.s32.totalorder %s30_s19, %s827_s27  ;;  %p833_p5 = scmp.lt.s32.totalorder %s827_s27, %s827_s27 }
   0xd   :  { %p834_p6 = por %p833_p5, %p832_p4 }
   0xf   :  { %p835_p7 = pnand %p834_p6, %p828_p3 }
  0x11   :  { %838 = shalt.err (!%p835_p7)
}
  0x12   :  { %s936_s28 = smov 64   ;;  %s937_s29 = smov 4  }
  0x13   :  { %35 = dma.hbm_to_vmem [thread:$0]  %s1103_s1, 256, %s30_s19, [#allocation6], %s936_s28, %s936_s28, %s937_s29  }
  0x14   :  { %s938_s7 = smov [#allocation2]   ;;  %s939_s9 = smov [#allocation7]  }
  0x15   :  { %s20_s8 = sshll.u32 %s938_s7, 4  ;;  %s41_s10 = sshll.u32 %s939_s9, 4  ;;  %s21_s8 = int_to_ptr.vmem [resolvable:$true] %s20_s8  ;;  %s42_s10 = int_to_ptr.vmem [resolvable:$true] %s41_s10 }
  0x16   :  { %s839_s13 = scalar_lea.hbm %s1102_s0, 128 }
  0x17   :  { %p840_p8 = scmp.ne.s32.totalorder %s1102_s0, %s839_s13  ;;  %p843_p9 = scmp.lt.u32.totalorder %s839_s13, %s1102_s0 }
  0x19   :  { %p845_p10 = pnand %p843_p9, %p840_p8 }
  0x1b   :  { %848 = shalt.err (!%p845_p10)
}
  0x1c   :  { %s849_s1 = scalar_lea.vmem %s21_s8, 128  ;;  %p854_p12 = scmp.lt.s32.totalorder %s21_s8, %s21_s8 }
  0x1d   :  { %p850_p11 = scmp.ne.s32.totalorder %s21_s8, %s849_s1  ;;  %p855_p13 = scmp.lt.s32.totalorder %s849_s1, %s849_s1 }
  0x1f   :  { %p856_p0 = por %p855_p13, %p854_p12 }
  0x21   :  { %p857_p1 = pnand %p856_p0, %p850_p11 }
  0x23   :  { %860 = shalt.err (!%p857_p1)
}
  0x24   :  { %23 = dma.hbm_to_vmem [thread:$0]  %s1102_s0, 128, %s21_s8, [#allocation3]  }
  0x25   :  { %s861_s22 = scalar_lea.hbm %s1104_s2, 3072 }
  0x26   :  { %p862_p2 = scmp.ne.s32.totalorder %s1104_s2, %s861_s22  ;;  %p865_p3 = scmp.lt.u32.totalorder %s861_s22, %s1104_s2 }
  0x28   :  { %p867_p4 = pnand %p865_p3, %p862_p2 }
  0x2a   :  { %870 = shalt.err (!%p867_p4)
}
  0x2b   :  { %s871_s27 = scalar_lea.vmem %s42_s10, 3072  ;;  %p876_p6 = scmp.lt.s32.totalorder %s42_s10, %s42_s10 }
  0x2c   :  { %p872_p5 = scmp.ne.s32.totalorder %s42_s10, %s871_s27  ;;  %p877_p7 = scmp.lt.s32.totalorder %s871_s27, %s871_s27 }
  0x2e   :  { %p878_p8 = por %p877_p7, %p876_p6 }
  0x30   :  { %p879_p9 = pnand %p878_p8, %p872_p5 }
  0x32   :  { %882 = shalt.err (!%p879_p9)
}
  0x33   :  { %47 = dma.hbm_to_vmem [thread:$0]  %s1104_s2, 3072, %s42_s10, [#allocation6], %s936_s28, %s936_s28, %s937_s29  }
  0x34   :  { %s940_s6 = smov [#allocation8]   ;;  %s883_s11 = scalar_lea.hbm %s1105_s3, 1024 }
  0x35   :  { %s53_s7 = sshll.u32 %s940_s6, 4  ;;  %p884_p10 = scmp.ne.s32.totalorder %s1105_s3, %s883_s11  ;;  %s54_s7 = int_to_ptr.vmem [resolvable:$true] %s53_s7 }
  0x36   :  { %p887_p11 = scmp.lt.u32.totalorder %s883_s11, %s1105_s3 }
  0x38   :  { %p889_p12 = pnand %p887_p11, %p884_p10 }
  0x3a   :  { %892 = shalt.err (!%p889_p12)
}
  0x3b   :  { %s893_s16 = scalar_lea.vmem %s54_s7, 1024  ;;  %p898_p0 = scmp.lt.s32.totalorder %s54_s7, %s54_s7 }
  0x3c   :  { %p894_p13 = scmp.ne.s32.totalorder %s54_s7, %s893_s16  ;;  %p899_p1 = scmp.lt.s32.totalorder %s893_s16, %s893_s16 }
  0x3e   :  { %p900_p2 = por %p899_p1, %p898_p0 }
  0x40   :  { %p901_p3 = pnand %p900_p2, %p894_p13 }
  0x42   :  { %904 = shalt.err (!%p901_p3)
}
  0x43   :  { %59 = dma.hbm_to_vmem [thread:$0]  %s1105_s3, 1024, %s54_s7, [#allocation9], %s936_s28, %s936_s28, %s937_s29  }
  0x44   :  { %927 = dma.done.wait [#allocation3], 128  }
  0x45   :  { %928 = vsyncadd [#allocation3], 4294967168 }
  0x46   :  { %929 = dma.done.wait [#allocation6], 3328  }
  0x47   :  { %930 = vsyncadd [#allocation6], 4294963968 }
  0x48   :  { %931 = dma.done.wait [#allocation9], 1024  }
  0x49   :  { %932 = vsyncadd [#allocation9], 4294966272  ;;  %v941_v0 = vmov 0.0   ;;  %vm942_vm0 = vmmov 0   ;;  %v783_v1 = vld [vmem:[#allocation5] sm:$0xff]   ;;  %v784_v2 = vld [vmem:[#allocation5 + $0x8] sm:$0xff]  }
  0x4a   :  { %686 = vmatprep.subr.bf16.mxu0 %v941_v0  ;;  %690 = vmatprep.mubr.msk.bf16.mxu0 %vm942_vm0, %v941_v0  ;;  %v75_v3 = vld [vmem:[#allocation2] sm:$0xff]  ;;  %v785_v4 = vld [vmem:[#allocation7] sm:$0xff]   ;;  %vm98_vm1 = vcmask 261120   ;;  %v787_v7 = vld [vmem:[#allocation7 + $0x10] sm:$0xff]   ;;  %s943_s23 = smov [#allocation10]   ;;  %vm588_vm2 = vcmask 64512  }
  0x4b   :  { %694 = vmatprep.subr.bf16.mxu1 %v941_v0  ;;  %710 = vmatprep.mubr.msk.bf16.mxu1 %vm942_vm0, %v941_v0  ;;  %v76_v5 = vpack.c.bf16 %v75_v3, %v75_v3  ;;  %v786_v6 = vld [vmem:[#allocation7 + $0x8] sm:$0xff]   ;;  %v788_v8 = vld [vmem:[#allocation7 + $0x18] sm:$0xff]   ;;  %v789_v9 = vld [vmem:[#allocation7 + $0x20] sm:$0xff]   ;;  %s596_s24 = sshll.u32 %s943_s23, 4  ;;  %s597_s24 = int_to_ptr.vmem [resolvable:$true] %s596_s24 }
  0x4c   :  { %687 = vmatpush3.bf16.msra.mxu0 %v783_v1  ;;  %695 = vmatpush3.bf16.msra.mxu1 %v785_v4  ;;  %v790_v10 = vld [vmem:[#allocation7 + $0x28] sm:$0xff]   ;;  %v791_v11 = vld [vmem:[#allocation7 + $0x30] sm:$0xff]   ;;  %v792_v12 = vld [vmem:[#allocation7 + $0x38] sm:$0xff]   ;;  %s905_s25 = scalar_lea.vmem %s597_s24, 128  ;;  %p910_p5 = scmp.lt.s32.totalorder %s597_s24, %s597_s24 }
  0x4d   :  { %688 = vmatprep.subr.bf16.mxu0 %v941_v0  ;;  %696 = vmatprep.subr.bf16.mxu1 %v941_v0  ;;  %v793_v13 = vld [vmem:[#allocation7 + $0x40] sm:$0xff]   ;;  %v794_v14 = vld [vmem:[#allocation7 + $0x48] sm:$0xff]   ;;  %v795_v15 = vld [vmem:[#allocation7 + $0x50] sm:$0xff]   ;;  %p906_p4 = scmp.ne.s32.totalorder %s597_s24, %s905_s25  ;;  %p911_p6 = scmp.lt.s32.totalorder %s905_s25, %s905_s25 }
  0x4e   :  { %v796_v16 = vld [vmem:[#allocation7 + $0x58] sm:$0xff]   ;;  %v797_v17 = vld [vmem:[#allocation7 + $0x60] sm:$0xff]   ;;  %v798_v18 = vld [vmem:[#allocation7 + $0x68] sm:$0xff]  }
  0x4f   :  { %v607_v19 = vld [vmem:[%s1106_s4] ss:$0 sm:$0xff]  ;;  %v799_v27 = vld [vmem:[#allocation7 + $0x70] sm:$0xff]   ;;  %v800_v28 = vld [vmem:[#allocation7 + $0x78] sm:$0xff]   ;;  %p912_p7 = por %p911_p6, %p910_p5 }
  0x50   :  { %689 = vmatpush3.bf16.msra.mxu0 %v784_v2  ;;  %697 = vmatpush3.bf16.msra.mxu1 %v786_v6  ;;  %v801_v29 = vld [vmem:[#allocation7 + $0x80] sm:$0xff]   ;;  %v802_v30 = vld [vmem:[#allocation7 + $0x88] sm:$0xff]   ;;  %v803_v31 = vld [vmem:[#allocation7 + $0x90] sm:$0xff]  }
  0x51   :  { %714 = vmatprep.subr.bf16.mxu0 %v941_v0  ;;  %698 = vmatprep.subr.bf16.mxu1 %v941_v0  ;;  %v804_v32 = vld [vmem:[#allocation7 + $0x98] sm:$0xff]   ;;  %v805_v33 = vld [vmem:[#allocation7 + $0xa0] sm:$0xff]   ;;  %v806_v34 = vld [vmem:[#allocation7 + $0xa8] sm:$0xff]   ;;  %p913_p8 = pnand %p912_p7, %p906_p4 }
  0x52   :  { %v611_v35 = vld [vmem:[%s1106_s4 + $0x1] ss:$0 sm:$0xff]  ;;  %v807_v43 = vld [vmem:[#allocation7 + $0xb0] sm:$0xff]   ;;  %v808_v44 = vld [vmem:[#allocation7 + $0xb8] sm:$0xff]  }
  0x53   :  { %691 = vmatmul.mubr.msk.bf16.vlgmr.msra.gmra.mrb[0].mxu0 %vm98_vm1, %v76_v5  ;;  %v809_v45 = vld [vmem:[#allocation8] sm:$0xff]   ;;  %v810_v46 = vld [vmem:[#allocation8 + $0x8] sm:$0xff]   ;;  %v811_v47 = vld [vmem:[#allocation8 + $0x10] sm:$0xff]  }
  0x54   :  { %730 = vmatprep.mubr.msk.bf16.mxu0 %vm942_vm0, %v941_v0  ;;  %699 = vmatpush3.bf16.msra.mxu1 %v787_v7  ;;  %v812_v48 = vld [vmem:[#allocation8 + $0x18] sm:$0xff]   ;;  %v813_v49 = vld [vmem:[#allocation8 + $0x20] sm:$0xff]   ;;  %v814_v50 = vld [vmem:[#allocation8 + $0x28] sm:$0xff]  }
  0x55   :  { %700 = vmatprep.subr.bf16.mxu1 %v941_v0  ;;  %715 = vmatpush3.bf16.msra.mxu0 %v793_v13  ;;  %v620_v51 = vld [vmem:[%s1106_s4 + $0x2] ss:$0 sm:$0xff]  ;;  %v815_v59 = vld [vmem:[#allocation8 + $0x30] sm:$0xff]   ;;  %v816_v60 = vld [vmem:[#allocation8 + $0x38] sm:$0xff]  }
  0x56   :  { %716 = vmatprep.subr.bf16.mxu0 %v941_v0  ;;  %v629_v61 = vld [vmem:[%s1106_s4 + $0x3] ss:$0 sm:$0xff]  ;;  %v638_v6 = vld [vmem:[%s1106_s4 + $0x4] ss:$0 sm:$0xff] }
  0x58   :  { %701 = vmatpush3.bf16.msra.mxu1 %v788_v8 }
  0x59   :  { %702 = vmatprep.subr.bf16.mxu1 %v941_v0  ;;  %717 = vmatpush3.bf16.msra.mxu0 %v794_v14 }
  0x5a   :  { %718 = vmatprep.subr.bf16.mxu0 %v941_v0 }
  0x5c   :  { %703 = vmatpush3.bf16.msra.mxu1 %v789_v9 }
  0x5d   :  { %704 = vmatprep.subr.bf16.mxu1 %v941_v0  ;;  %719 = vmatpush3.bf16.msra.mxu0 %v795_v15 }
  0x5e   :  { %720 = vmatprep.subr.bf16.mxu0 %v941_v0 }
  0x60   :  { %705 = vmatpush3.bf16.msra.mxu1 %v790_v10 }
  0x61   :  { %706 = vmatprep.subr.bf16.mxu1 %v941_v0  ;;  %721 = vmatpush3.bf16.msra.mxu0 %v796_v16 }
  0x62   :  { %722 = vmatprep.subr.bf16.mxu0 %v941_v0 }
  0x64   :  { %707 = vmatpush3.bf16.msra.mxu1 %v791_v11 }
  0x65   :  { %708 = vmatprep.subr.bf16.mxu1 %v941_v0  ;;  %723 = vmatpush3.bf16.msra.mxu0 %v797_v17 }
  0x66   :  { %724 = vmatprep.subr.bf16.mxu0 %v941_v0 }
  0x68   :  { %709 = vmatpush3.bf16.msra.mxu1 %v792_v12 }
  0x69   :  { %734 = vmatprep.subr.bf16.mxu1 %v941_v0  ;;  %725 = vmatpush3.bf16.msra.mxu0 %v798_v18 }
  0x6a   :  { %726 = vmatprep.subr.bf16.mxu0 %v941_v0 }
  0x6d   :  { %727 = vmatpush3.bf16.msra.mxu0 %v799_v27 }
  0x6e   :  { %728 = vmatprep.subr.bf16.mxu0 %v941_v0 }
  0x71   :  { %729 = vmatpush3.bf16.msra.mxu0 %v800_v28 }
  0x72   :  { %754 = vmatprep.subr.bf16.mxu0 %v941_v0 }
 0x126   :  { %v136_v20 = vpop.f32.mrb[0].mxu0 }
 0x127   :  { %v137_v21 = vadd.f32 %v607_v19, %v136_v20  ;;  %v692_v22 = vpop.f32.mrb[1].mxu0 }
 0x128   :  { %v139_v23 = vpop.f32.mrb[2].mxu0 }
 0x129   :  { %v142_v24 = vmax.f32 %v137_v21, 0.0  ;;  %v693_v25 = vpop.f32.mrb[3].mxu0 }
 0x12b   :  { %v143_v26 = vpack.c.bf16 %v142_v24, %v142_v24 }
 0x12d   :  { %711 = vmatmul.mubr.bf16.vlgmr.msra.gmra.mrb[0].mxu1 %v143_v26 }
 0x12e   :  { %750 = vmatprep.mubr.msk.bf16.mxu1 %vm942_vm0, %v941_v0  ;;  %735 = vmatpush3.bf16.msra.mxu1 %v801_v29 }
 0x12f   :  { %736 = vmatprep.subr.bf16.mxu1 %v941_v0 }
 0x132   :  { %737 = vmatpush3.bf16.msra.mxu1 %v802_v30 }
 0x133   :  { %738 = vmatprep.subr.bf16.mxu1 %v941_v0 }
 0x136   :  { %739 = vmatpush3.bf16.msra.mxu1 %v803_v31 }
 0x137   :  { %740 = vmatprep.subr.bf16.mxu1 %v941_v0 }
 0x13a   :  { %741 = vmatpush3.bf16.msra.mxu1 %v804_v32 }
 0x13b   :  { %742 = vmatprep.subr.bf16.mxu1 %v941_v0 }
 0x13e   :  { %743 = vmatpush3.bf16.msra.mxu1 %v805_v33 }
 0x13f   :  { %744 = vmatprep.subr.bf16.mxu1 %v941_v0 }
 0x142   :  { %745 = vmatpush3.bf16.msra.mxu1 %v806_v34 }
 0x143   :  { %746 = vmatprep.subr.bf16.mxu1 %v941_v0 }
 0x146   :  { %747 = vmatpush3.bf16.msra.mxu1 %v807_v43 }
 0x147   :  { %748 = vmatprep.subr.bf16.mxu1 %v941_v0 }
 0x14a   :  { %749 = vmatpush3.bf16.msra.mxu1 %v808_v44 }
 0x200   :  { %v247_v36 = vpop.f32.mrb[0].mxu1 }
 0x201   :  { %v248_v37 = vadd.f32 %v611_v35, %v247_v36  ;;  %v712_v38 = vpop.f32.mrb[1].mxu1 }
 0x202   :  { %v250_v39 = vpop.f32.mrb[2].mxu1 }
 0x203   :  { %v253_v40 = vmax.f32 %v248_v37, 0.0  ;;  %v713_v41 = vpop.f32.mrb[3].mxu1 }
 0x205   :  { %v254_v42 = vpack.c.bf16 %v253_v40, %v253_v40 }
 0x207   :  { %731 = vmatmul.mubr.bf16.vlgmr.msra.gmra.mrb[4].mxu0 %v254_v42 }
 0x208   :  { %770 = vmatprep.mubr.msk.bf16.mxu0 %vm942_vm0, %v941_v0  ;;  %755 = vmatpush3.bf16.msra.mxu0 %v809_v45 }
 0x209   :  { %756 = vmatprep.subr.bf16.mxu0 %v941_v0 }
 0x20c   :  { %757 = vmatpush3.bf16.msra.mxu0 %v810_v46 }
 0x20d   :  { %758 = vmatprep.subr.bf16.mxu0 %v941_v0 }
 0x210   :  { %759 = vmatpush3.bf16.msra.mxu0 %v811_v47 }
 0x211   :  { %760 = vmatprep.subr.bf16.mxu0 %v941_v0 }
 0x214   :  { %761 = vmatpush3.bf16.msra.mxu0 %v812_v48 }
 0x215   :  { %762 = vmatprep.subr.bf16.mxu0 %v941_v0 }
 0x218   :  { %763 = vmatpush3.bf16.msra.mxu0 %v813_v49 }
 0x219   :  { %764 = vmatprep.subr.bf16.mxu0 %v941_v0 }
 0x21c   :  { %765 = vmatpush3.bf16.msra.mxu0 %v814_v50 }
 0x21d   :  { %766 = vmatprep.subr.bf16.mxu0 %v941_v0 }
 0x220   :  { %767 = vmatpush3.bf16.msra.mxu0 %v815_v59 }
 0x221   :  { %768 = vmatprep.subr.bf16.mxu0 %v941_v0 }
 0x224   :  { %769 = vmatpush3.bf16.msra.mxu0 %v816_v60 }
 0x2da   :  { %v359_v52 = vpop.f32.mrb[4].mxu0 }
 0x2db   :  { %v360_v53 = vadd.f32 %v620_v51, %v359_v52  ;;  %v732_v54 = vpop.f32.mrb[5].mxu0 }
 0x2dc   :  { %v362_v55 = vpop.f32.mrb[6].mxu0 }
 0x2dd   :  { %v365_v56 = vmax.f32 %v360_v53, 0.0  ;;  %v733_v57 = vpop.f32.mrb[7].mxu0 }
 0x2df   :  { %v366_v58 = vpack.c.bf16 %v365_v56, %v365_v56 }
 0x2e1   :  { %751 = vmatmul.mubr.bf16.vlgmr.msra.gmra.mrb[4].mxu1 %v366_v58 }
 0x3b4   :  { %v471_v62 = vpop.f32.mrb[4].mxu1 }
 0x3b5   :  { %v472_v63 = vadd.f32 %v629_v61, %v471_v62  ;;  %v752_v1 = vpop.f32.mrb[5].mxu1 }
 0x3b6   :  { %v474_v2 = vpop.f32.mrb[6].mxu1 }
 0x3b7   :  { %v477_v3 = vmax.f32 %v472_v63, 0.0  ;;  %v753_v4 = vpop.f32.mrb[7].mxu1 }
 0x3b9   :  { %v478_v5 = vpack.c.bf16 %v477_v3, %v477_v3 }
 0x3bb   :  { %771 = vmatmul.mubr.bf16.vlgmr.msra.gmra.mrb[8].mxu0 %v478_v5 }
 0x48e   :  { %v582_v0 = vpop.f32.mrb[8].mxu0 }
 0x48f   :  { %v583_v7 = vadd.f32 %v638_v6, %v582_v0  ;;  %v772_v8 = vpop.f32.mrb[9].mxu0 }
 0x490   :  { %v585_v9 = vpop.f32.mrb[10].mxu0 }
 0x491   :  { %v773_v10 = vpop.f32.mrb[11].mxu0  ;;  %589 = vst.msk [vmem:[#allocation10] sm:$0xff] %vm588_vm2, %v583_v7 }
 0x492   :  { %916 = shalt.err (!%p913_p8)
}
 0x493   :  { %s917_s4 = scalar_lea.hbm %s1107_s5, 128 }
 0x494   :  { %p918_p9 = scmp.ne.s32.totalorder %s1107_s5, %s917_s4  ;;  %p921_p10 = scmp.lt.u32.totalorder %s917_s4, %s1107_s5 }
 0x496   :  { %p923_p11 = pnand %p921_p10, %p918_p9 }
 0x498   :  { %926 = shalt.err (!%p923_p11)
}
 0x499   :  { %599 = dma.vmem_to_hbm [thread:$0]  %s597_s24, 128, %s1107_s5, [#allocation4]  }
 0x49a   :  { %933 = dma.done.wait [#allocation4], 128  }
 0x49b   :  { %934 = vsyncadd [#allocation4], 4294967168 }
 0x49c   :  { %603 = vsyncpa [#allocation3], 1 }
 0x49d   :  { %604 = vsyncpa [#allocation6], 1 }
 0x49e   :  { %605 = vsyncpa [#allocation9], 1 }
 0x49f   :  { %606 = vsyncpa [#allocation4], 1 }

</bundles_post_ra>
